<compile_context>
chip_gen: v5e
topology: v5e:2x2
jax: 0.10.0
libtpu: 0.0.40
codegen_flags: <defaults>
</compile_context>

<pallas_src>
import jax
import jax.numpy as jnp
from jax.experimental import pallas as pl
from jax.experimental.pallas import tpu as pltpu


def _masked_l1_kernel(olens_ref, after_ref, before_ref, ys_ref, out_ref, acc_ref):
    """Grid = (B, num_L_tiles); axis 0 'parallel', axis 1 'arbitrary'.

    after/before/ys : (tl, odim) tiles (batch dim squeezed)
    olens_ref       : (B,) int32 in SMEM (scalar prefetch)
    out_ref         : (1, 1, 1) per-batch masked L1 sum
    acc_ref         : (1, odim) f32 partial-sum accumulator
    """
    b = pl.program_id(0)
    i = pl.program_id(1)

    @pl.when(i == 0)
    def _init():
        acc_ref[...] = jnp.zeros_like(acc_ref)

    tl = ys_ref.shape[0]
    # In-kernel non-pad mask: row l is valid iff l < olens[b].  Built from
    # scalar-prefetched lengths, so no per-row mask stream hits HBM.
    row = i * tl + jax.lax.broadcasted_iota(jnp.int32, (tl, 1), 0)
    valid = row < olens_ref[b]                               # (tl, 1) bool

    ys = ys_ref[...].astype(jnp.float32)
    diff = (jnp.abs(before_ref[...].astype(jnp.float32) - ys)
            + jnp.abs(after_ref[...].astype(jnp.float32) - ys))
    # jnp.where (not mask-multiply) so out-of-bounds garbage/NaN in the padded
    # tail of the last L-tile is discarded, never multiplied.
    contrib = jnp.where(valid, diff, 0.0)
    # Sublane reduce per step -> tiny (1, odim) accumulator RMW.
    acc_ref[...] += jnp.sum(contrib, axis=0, keepdims=True)

    @pl.when(i == pl.num_programs(1) - 1)
    def _finalize():
        out_ref[...] = jnp.zeros((1, 1, 1), jnp.float32) + jnp.sum(acc_ref[...])


def _duration_loss_kernel(d_outs_ref, ds_ref, imask_ref, out_ref):
    """Masked MSE in log-duration domain (offset=1).  Single grid step."""
    im = imask_ref[...] > 0.0
    imf = im.astype(jnp.float32)
    ds = jnp.where(im, ds_ref[...].astype(jnp.float32), 0.0)
    err = d_outs_ref[...].astype(jnp.float32) - jnp.log(ds + 1.0)
    loss = jnp.sum(jnp.where(im, err * err, 0.0)) / jnp.sum(imf)
    out_ref[...] = jnp.zeros((1, 1), jnp.float32) + loss


def feed_forward_transformer_loss(after_outs, before_outs, d_outs, ys, ds,
                                  i_mask, o_mask, *, tile_l=2048):
    """Returns (l1_loss, duration_loss) as f32 scalars."""
    B, L, D = ys.shape
    T = ds.shape[1]

    def _rup(x, m):
        return (x + m - 1) // m * m

    # o_mask is a non-pad (prefix) mask per the module contract; collapse it
    # to lengths so no per-row mask stream is DMA'd.
    olens = jnp.sum(o_mask.astype(jnp.int32), axis=1)        # (B,) int32

    # L-tile: full extent if it fits, else a multiple of 8 sublanes.
    tl = L if L <= tile_l else _rup(tile_l, 8)
    n_lt = pl.cdiv(L, tl)

    l1_parts = pl.pallas_call(
        _masked_l1_kernel,
        out_shape=jax.ShapeDtypeStruct((B, 1, 1), jnp.float32),
        grid_spec=pltpu.PrefetchScalarGridSpec(
            num_scalar_prefetch=1,
            grid=(B, n_lt),
            in_specs=[
                pl.BlockSpec((None, tl, D), lambda b, i, olens: (b, i, 0)),  # after
                pl.BlockSpec((None, tl, D), lambda b, i, olens: (b, i, 0)),  # before
                pl.BlockSpec((None, tl, D), lambda b, i, olens: (b, i, 0)),  # ys
            ],
            out_specs=pl.BlockSpec((1, 1, 1), lambda b, i, olens: (b, 0, 0)),
            scratch_shapes=[pltpu.VMEM((1, D), jnp.float32)],
        ),
        compiler_params=pltpu.CompilerParams(
            dimension_semantics=("parallel", "arbitrary"),
        ),
    )(olens, after_outs, before_outs, ys)

    # Both L1 means divide by the same masked count N:
    #   mean(|b-y|) + mean(|a-y|) == (sum_b + sum_a) / N,  N = sum(o_mask)*odim
    n_out = jnp.sum(olens).astype(jnp.float32) * jnp.float32(D)
    l1_loss = jnp.sum(l1_parts) / n_out

    # Tiny O(B*T) duration loss in its own single-step kernel.
    dur = pl.pallas_call(
        _duration_loss_kernel,
        out_shape=jax.ShapeDtypeStruct((1, 1), jnp.float32),
        grid=(1,),
        in_specs=[
            pl.BlockSpec((B, T), lambda i: (0, 0)),
            pl.BlockSpec((B, T), lambda i: (0, 0)),
            pl.BlockSpec((B, T), lambda i: (0, 0)),
        ],
        out_specs=pl.BlockSpec((1, 1), lambda i: (0, 0)),
    )(d_outs, ds, i_mask.astype(jnp.float32))
    dur_loss = dur[0, 0]

    return l1_loss, dur_loss


if __name__ == "__main__":
    key = jax.random.PRNGKey(0)
    B, L, D, T = 2, 16, 80, 8      # batch, Lmax, odim(=80 as in module), Tmax

    k1, k2, k3, k4, k5 = jax.random.split(key, 5)
    after_outs = jax.random.normal(k1, (B, L, D), dtype=jnp.float32)
    before_outs = jax.random.normal(k2, (B, L, D), dtype=jnp.float32)
    ys = jax.random.normal(k3, (B, L, D), dtype=jnp.float32)
    d_outs = jax.random.normal(k4, (B, T), dtype=jnp.float32)
    ds = jax.random.randint(k5, (B, T), 0, 10).astype(jnp.float32)

    olens = jnp.array([16, 12], dtype=jnp.int32)
    ilens = jnp.array([8, 6], dtype=jnp.int32)
    o_mask = jnp.arange(L)[None, :] < olens[:, None]    # (B, L) bool
    i_mask = jnp.arange(T)[None, :] < ilens[:, None]    # (B, T) bool

    l1_loss, dur_loss = feed_forward_transformer_loss(
        after_outs, before_outs, d_outs, ys, ds, i_mask, o_mask)
    jax.block_until_ready((l1_loss, dur_loss))

    # Pure-JAX reference of the masked_select + mean semantics.
    om3 = o_mask[:, :, None].astype(jnp.float32)
    n_out = jnp.sum(o_mask).astype(jnp.float32) * D
    ref_l1 = (jnp.sum(jnp.abs(before_outs - ys) * om3)
              + jnp.sum(jnp.abs(after_outs - ys) * om3)) / n_out
    imf = i_mask.astype(jnp.float32)
    ref_dur = jnp.sum(((d_outs - jnp.log(ds + 1.0)) ** 2) * imf) / jnp.sum(imf)

    assert jnp.allclose(l1_loss, ref_l1, rtol=1e-5, atol=1e-5)
    assert jnp.allclose(dur_loss, ref_dur, rtol=1e-5, atol=1e-5)
    print("KERNEL_OK")
</pallas_src>

<mosaic_0001>
module attributes {stable_mosaic.version = 11 : i64} {
  func.func @_masked_l1_kernel(%arg0: i32, %arg1: i32, %arg2: memref<2xi32, #tpu.memory_space<smem>>, %arg3: memref<1x16x80xf32, #tpu.memory_space<vmem>>, %arg4: memref<1x16x80xf32, #tpu.memory_space<vmem>>, %arg5: memref<1x16x80xf32, #tpu.memory_space<vmem>>, %arg6: memref<1x1x1xf32, #tpu.memory_space<vmem>>, %arg7: memref<1x80xf32, #tpu.memory_space<vmem>>) attributes {dimension_semantics = [#tpu.dimension_semantics<parallel>, #tpu.dimension_semantics<arbitrary>], iteration_bounds = array<i64: 2, 1>, scalar_prefetch = 1 : i64, scratch_operands = 1 : i64, tpu.core_type = #tpu.core_type<tc>, window_params = [{transform_indices = @transform_0, window_bounds = array<i64: 1, 16, 80>}, {transform_indices = @transform_1, window_bounds = array<i64: 1, 16, 80>}, {transform_indices = @transform_2, window_bounds = array<i64: 1, 16, 80>}, {transform_indices = @transform_3, window_bounds = array<i64: 1, 1, 1>}]} {
    %c0_i32 = arith.constant 0 : i32
    %0 = arith.cmpi eq, %arg1, %c0_i32 : i32
    %1 = arith.extui %0 : i1 to i32
    %c0_i32_0 = arith.constant 0 : i32
    %2 = arith.cmpi ne, %1, %c0_i32_0 : i32
    scf.if %2 {
      %cst_16 = arith.constant 0.000000e+00 : f32
      %34 = vector.broadcast %cst_16 : f32 to vector<1x80xf32>
      %c0_17 = arith.constant 0 : index
      %c0_18 = arith.constant 0 : index
      %35 = vector.load %arg7[%c0_17, %c0_18] : memref<1x80xf32, #tpu.memory_space<vmem>>, vector<1x80xf32>
      tpu.vector_store %arg7[%c0_17, %c0_18], %34 {strides = array<i32>} : memref<1x80xf32, #tpu.memory_space<vmem>>, vector<1x80xf32>,
    } else {
    }
    %c16_i32 = arith.constant 16 : i32
    %3 = arith.muli %arg1, %c16_i32 : i32
    %4 = tpu.iota {dimensions = array<i32: 0>} : vector<16x1xi32>
    %5 = vector.broadcast %3 : i32 to vector<16x1xi32>
    %6 = arith.addi %5, %4 : vector<16x1xi32>
    %7 = arith.index_cast %arg0 : i32 to index
    %8 = memref.load %arg2[%7] : memref<2xi32, #tpu.memory_space<smem>>
    %9 = vector.broadcast %8 : i32 to vector<16x1xi32>
    %10 = arith.cmpi slt, %6, %9 : vector<16x1xi32>
    %c0 = arith.constant 0 : index
    %c0_1 = arith.constant 0 : index
    %c0_2 = arith.constant 0 : index
    %11 = vector.load %arg5[%c0, %c0_1, %c0_2] : memref<1x16x80xf32, #tpu.memory_space<vmem>>, vector<1x16x80xf32>
    %12 = vector.shape_cast %11 : vector<1x16x80xf32> to vector<16x80xf32>
    %c0_3 = arith.constant 0 : index
    %c0_4 = arith.constant 0 : index
    %c0_5 = arith.constant 0 : index
    %13 = vector.load %arg4[%c0_3, %c0_4, %c0_5] : memref<1x16x80xf32, #tpu.memory_space<vmem>>, vector<1x16x80xf32>
    %14 = vector.shape_cast %13 : vector<1x16x80xf32> to vector<16x80xf32>
    %15 = arith.subf %14, %12 : vector<16x80xf32>
    %16 = math.absf %15 : vector<16x80xf32>
    %c0_6 = arith.constant 0 : index
    %c0_7 = arith.constant 0 : index
    %c0_8 = arith.constant 0 : index
    %17 = vector.load %arg3[%c0_6, %c0_7, %c0_8] : memref<1x16x80xf32, #tpu.memory_space<vmem>>, vector<1x16x80xf32>
    %18 = vector.shape_cast %17 : vector<1x16x80xf32> to vector<16x80xf32>
    %19 = arith.subf %18, %12 : vector<16x80xf32>
    %20 = math.absf %19 : vector<16x80xf32>
    %21 = arith.addf %16, %20 : vector<16x80xf32>
    %cst = arith.constant 0.000000e+00 : f32
    %22 = vector.shape_cast %10 : vector<16x1xi1> to vector<16x1xi1>
    %23 = vector.broadcast %22 : vector<16x1xi1> to vector<16x80xi1>
    %24 = vector.broadcast %cst : f32 to vector<16x80xf32>
    %25 = arith.select %23, %21, %24 : vector<16x80xi1>, vector<16x80xf32>
    %c0_9 = arith.constant 0 : index
    %c0_10 = arith.constant 0 : index
    %26 = vector.load %arg7[%c0_9, %c0_10] : memref<1x80xf32, #tpu.memory_space<vmem>>, vector<1x80xf32>
    %cst_11 = arith.constant dense<0.000000e+00> : vector<80xf32>
    %27 = vector.multi_reduction <add>, %25, %cst_11 [0] : vector<16x80xf32> to vector<80xf32>
    %28 = vector.shape_cast %27 : vector<80xf32> to vector<1x80xf32>
    %29 = arith.addf %26, %28 : vector<1x80xf32>
    %c0_12 = arith.constant 0 : index
    %c0_13 = arith.constant 0 : index
    %30 = vector.load %arg7[%c0_12, %c0_13] : memref<1x80xf32, #tpu.memory_space<vmem>>, vector<1x80xf32>
    tpu.vector_store %arg7[%c0_12, %c0_13], %29 {strides = array<i32>} : memref<1x80xf32, #tpu.memory_space<vmem>>, vector<1x80xf32>,
    %c0_i32_14 = arith.constant 0 : i32
    %31 = arith.cmpi eq, %arg1, %c0_i32_14 : i32
    %32 = arith.extui %31 : i1 to i32
    %c0_i32_15 = arith.constant 0 : i32
    %33 = arith.cmpi ne, %32, %c0_i32_15 : i32
    scf.if %33 {
      %cst_16 = arith.constant 0.000000e+00 : f32
      %34 = vector.broadcast %cst_16 : f32 to vector<1x1x1xf32>
      %c0_17 = arith.constant 0 : index
      %c0_18 = arith.constant 0 : index
      %35 = vector.load %arg7[%c0_17, %c0_18] : memref<1x80xf32, #tpu.memory_space<vmem>>, vector<1x80xf32>
      %36 = vector.shape_cast %35 : vector<1x80xf32> to vector<1x1x80xf32>
      %cst_19 = arith.constant dense<0.000000e+00> : vector<1xf32>
      %37 = vector.multi_reduction <add>, %36, %cst_19 [1, 2] : vector<1x1x80xf32> to vector<1xf32>
      %38 = vector.shape_cast %37 : vector<1xf32> to vector<1x1x1xf32>
      %39 = vector.extract %38[0, 0, 0] : f32 from vector<1x1x1xf32>
      %40 = vector.broadcast %39 : f32 to vector<1x1x1xf32>
      %41 = arith.addf %34, %40 : vector<1x1x1xf32>
      %c0_20 = arith.constant 0 : index
      %c0_21 = arith.constant 0 : index
      %c0_22 = arith.constant 0 : index
      %42 = vector.load %arg6[%c0_20, %c0_21, %c0_22] : memref<1x1x1xf32, #tpu.memory_space<vmem>>, vector<1x1x1xf32>
      tpu.vector_store %arg6[%c0_20, %c0_21, %c0_22], %41 {strides = array<i32>} : memref<1x1x1xf32, #tpu.memory_space<vmem>>, vector<1x1x1xf32>,
    } else {
    }
    return
  }
  func.func @transform_0(%arg0: i32, %arg1: i32, %arg2: memref<2xi32, #tpu.memory_space<smem>>) -> (i32, i32, i32) {
    %c0_i32 = arith.constant 0 : i32
    %c0_i32_0 = arith.constant 0 : i32
    return %arg0, %arg1, %c0_i32 : i32, i32, i32
  }
  func.func @transform_1(%arg0: i32, %arg1: i32, %arg2: memref<2xi32, #tpu.memory_space<smem>>) -> (i32, i32, i32) {
    %c0_i32 = arith.constant 0 : i32
    %c0_i32_0 = arith.constant 0 : i32
    return %arg0, %arg1, %c0_i32 : i32, i32, i32
  }
  func.func @transform_2(%arg0: i32, %arg1: i32, %arg2: memref<2xi32, #tpu.memory_space<smem>>) -> (i32, i32, i32) {
    %c0_i32 = arith.constant 0 : i32
    %c0_i32_0 = arith.constant 0 : i32
    return %arg0, %arg1, %c0_i32 : i32, i32, i32
  }
  func.func @transform_3(%arg0: i32, %arg1: i32, %arg2: memref<2xi32, #tpu.memory_space<smem>>) -> (i32, i32, i32) {
    %c0_i32 = arith.constant 0 : i32
    %c0_i32_0 = arith.constant 0 : i32
    %c0_i32_1 = arith.constant 0 : i32
    return %arg0, %c0_i32, %c0_i32_0 : i32, i32, i32
  }
}

</mosaic_0001>

<bundles_post_ra>
// kernel: tpu_custom_call.1
= control target key start
LH: loop header
LB: loop body
LE: loop exit
PB: predicated region body
PF: predicated region fallthrough
CT: control target
= control target key end

     0   :  { %s749_s18 = smov [#allocation4]   ;;  %s903_s0 = inlined_call_operand.hbm [shape: s32[2], index: 0, kind: input, shape index: {}]   ;;  %s904_s1 = inlined_call_operand.hbm [shape: f32[2,16,80], index: 1, kind: input, shape index: {}]   ;;  %s905_s2 = inlined_call_operand.hbm [shape: f32[2,16,80], index: 2, kind: input, shape index: {}]   ;;  %s906_s3 = inlined_call_operand.hbm [shape: f32[2,16,80], index: 3, kind: input, shape index: {}]   ;;  %s907_s4 = inlined_call_operand.vmem [shape: f32[2,1,1], index: 4, kind: output, shape index: {}]  }
   0x1   :  { %910 = sst [smem:[#allocation14_spill]] %s905_s2  ;;  %s10_s17 = sshll.u32 %s903_s0, 4  ;;  %s11_s17 = int_to_ptr.hbm [resolvable:$true] %s10_s17 }
   0x2   :  { %13 = dma.hbm_to_smem %s11_s17, 16, %s749_s18, [#allocation3] }
   0x3   :  { %715 = dma.done.wait [#allocation3], 16 }
   0x4   :  { %716 = vsyncadd [#allocation3], 4294967280 }
   0x5   :  { %16 = sfence }
   0x6   :  { %17 = vsyncpa [#allocation6], 0 }
   0x7   :  { %19 = vsyncpa [#allocation6 + $0x1], 0 }
   0x8   :  { %20 = vsyncpa [#allocation8], 0 }
   0x9   :  { %22 = vsyncpa [#allocation8 + $0x1], 0  ;;  %s781_s19 = smov 0   ;;  %s783_s20 = smov 0  }
   0xa   :  { %s785_s21 = smov 0   ;;  %s787_s22 = smov 0  }
   0xb   :  { %s789_s23 = smov 0   ;;  %s791_s0 = smov 0  }
   0xc LB: > { %s908_s24 = sadd.s32 4294967295, %s747_s0   ;;  %s40_s25 = sadd.s32 1, %s743_s23  ;;  %s747_s0 = sphi %s791_s0, %s28_s0   ;;  %s743_s23 = sphi %s789_s23, %s922_s23   ;;  %s739_s22 = sphi %s787_s22, %s921_s22   ;;  %s735_s21 = sphi %s785_s21, %s920_s21   ;;  %s731_s20 = sphi %s783_s20, %s919_s20   ;;  %s727_s19 = sphi %s781_s19, %s918_s19  }
   0xd   : > { %p42_p0 = scmp.ge.s32.totalorder %s40_s25, 2  ;;  %s49_s26 = sadd.s32 1, %s735_s21 }
   0xe   : > { %p56_p1 = scmp.ne.s32.totalorder %s735_s21, %s731_s20  ;;  %p57_p2 = scmp.eq.s32.totalorder %s747_s0, 0 }
   0xf   : > { %s924_s25 = smov (%p42_p0, %s40_s25), 0  ;;  %p62_p4 = scmp.ne.s32.totalorder %s731_s20, %s727_s19 }
  0x10   : > { %911 = sst [smem:[#allocation13_spill]] %s924_s25  ;;  %p58_p3 = por %p57_p2, %p56_p1 }
  0x11   : > { %s44_s27 = ssub.s32 %s743_s23, %s924_s25  ;;  %p63_p5 = scmp.eq.s32.totalorder %s908_s24, 0 }
  0x12   : > { %p47_p6 = scmp.eq.s32.totalorder %s44_s27, 0  ;;  %p536_p8 = scmp.lt.s32.totalorder %s747_s0, 2 }
  0x13   : > { %p822_p7 = por %p63_p5, %p62_p4  ;;  %s168_s30 = sand.u32 1, %s735_s21  }
  0x14   : > { %s828_s29 = scalar_select %p47_p6, %s735_s21, %s49_s26  }
  0x15   : > { %s832_s5 = sshll.u32 %s743_s23, 4  ;;  %s500_s6 = sshll.u32 %s168_s30, 4 }
  0x16   : > { %p834_p9 = pnand %p536_p8, %p58_p3  ;;  %s192_s8 = sand.u32 1, %s747_s0  }
  0x17   : > { %s914_s2 = sld [smem:[#allocation14_spill]]  ;;  %s196_s12 = scalar_lea.vmem [#allocation7], %s500_s6 }
  0x18   : > { %s206_s13 = sshll.u32 %s196_s12, 4  ;;  %p509_p10 = scmp.ge.s32.totalorder %s747_s0, 1  ;;  %s207_s13 = int_to_ptr.vmem [resolvable:$true] %s206_s13 }
  0x19   : > { %s193_s15 = scalar_lea.sflag [#allocation8], %s192_s8  ;;  %s750_s16 = smov 128  }
  0x1a   : > { %s751_s17 = smov 8   ;;  %p238_p11 = scmp.lt.s32.totalorder %s747_s0, 3 }
  0x1b   : > { %s179_s27 = scalar_lea.hbm %s904_s1, %s832_s5  ;;  %s172_s9 = scalar_lea.vmem [#allocation5], %s500_s6 }
  0x1c   : > { %p847_p12 = pnand %p509_p10, %p238_p11  ;;  %s182_s10 = sshll.u32 %s172_s9, 4  ;;  %s183_s10 = int_to_ptr.vmem [resolvable:$true] %s182_s10 }
  0x1d   : > { %s203_s11 = scalar_lea.hbm %s914_s2, %s832_s5  ;;  %s169_s8 = scalar_lea.sflag [#allocation6], %s168_s30 }
  0x1e   : > { %s204_s14 = sshll.u32 %s203_s11, 4  ;;  %s180_s11 = sshll.u32 %s179_s27, 4  ;;  %s205_s14 = int_to_ptr.hbm [resolvable:$true] %s204_s14  ;;  %s181_s11 = int_to_ptr.hbm [resolvable:$true] %s180_s11 }
  0x1f   : > { %532 = dma.hbm_to_vmem [thread:$0]  (!%p834_p9), %s205_s14, 256, %s207_s13, %s193_s15, %s750_s16, %s750_s16, %s751_s17  }
  0x20   : > { %529 = dma.hbm_to_vmem [thread:$0]  (!%p834_p9), %s181_s11, 256, %s183_s10, %s169_s8, %s750_s16, %s750_s16, %s751_s17  }
  0x21   : > { %s227_s14 = scalar_lea.hbm %s906_s3, %s832_s5  ;;  %s220_s24 = scalar_lea.vmem [#allocation9], %s500_s6 }
  0x22   : > { %s230_s2 = sshll.u32 %s220_s24, 4  ;;  %s228_s25 = sshll.u32 %s227_s14, 4  ;;  %s231_s2 = int_to_ptr.vmem [resolvable:$true] %s230_s2  ;;  %s229_s25 = int_to_ptr.hbm [resolvable:$true] %s228_s25 }
  0x23   : > { %535 = dma.hbm_to_vmem [thread:$0]  (!%p834_p9), %s229_s25, 256, %s231_s2, %s193_s15, %s750_s16, %s750_s16, %s751_s17  }
  0x24   : > { %242 = sbr.rel (%p847_p12) target bundleno = 263 (0x107), region = 32  ;;  %s244_s19 = sand.u32 (!%p847_p12), 1, %s731_s20  }
  0x25   : > { %s510_s30 = sshll.u32 (!%p847_p12), %s244_s19, 4  ;;  %s245_s26 = scalar_lea.sflag (!%p847_p12), [#allocation6], %s244_s19 }
  0x26   : > { %s248_s27 = scalar_lea.vmem (!%p847_p12), [#allocation5], %s510_s30 }
  0x29   : > { %718 = dma.done.wait (%p822_p7), %s245_s26, 256  }
  0x2a   : > { %720 = vsyncadd (%p822_p7), %s245_s26, 4294967040  ;;  %s916_s24 = sadd.s32 4294967295, %s747_s0   ;;  %s258_s2 = scalar_lea.vmem [#allocation7], %s510_s30 }
  0x2b   : > { %s254_s5 = sand.u32 1, %s916_s24  }
  0x2c   : > { %s255_s6 = scalar_lea.sflag [#allocation8], %s254_s5 }
  0x2d   : > { %722 = dma.done.wait (%p822_p7), %s255_s6, 512  }
  0x2e   : > { %724 = vsyncadd (%p822_p7), %s255_s6, 4294966784  ;;  %vm310_vm0 = vcmask 647168   ;;  %v313_v0 = vlaneseq  ;;  %v752_v1 = vmov 0.0   ;;  %s319_s25 = sld [smem:[#allocation4 + %s739_s22]]  ;;  %s268_s7 = scalar_lea.vmem [#allocation9], %s510_s30  ;;  %v325_v5 = vld [vmem:[%s258_s2] sm:$0xff] }
  0x2f   : > { %311 = vst.msk [vmem:[#allocation2] sm:$0x1] %vm310_vm0, %v752_v1  ;;  %v323_v3 = vld [vmem:[%s268_s7] sm:$0xff]  ;;  %v324_v4 = vld [vmem:[%s268_s7 + $0x8] sm:$0xff]  ;;  %vm346_vm3 = vcmask 654336   ;;  %p303_p13 = scmp.lt.s32.totalorder %s739_s22, 1 }
  0x30   : > { %v314_v2 = vshrl.u32 %v313_v0, 7  ;;  %v326_v7 = vld [vmem:[%s258_s2 + $0x8] sm:$0xff]  ;;  %v327_v8 = vsub.f32 %v325_v5, %v323_v3  ;;  %v331_v9 = vld [vmem:[%s248_s27] sm:$0xff]  ;;  %vm375_vm4 = vcmask 0  }
  0x31   : > { %v332_v10 = vld [vmem:[%s248_s27 + $0x8] sm:$0xff]  ;;  %v328_v12 = vsub.f32 %v326_v7, %v324_v4  ;;  %v333_v13 = vsub.f32 %v331_v9, %v323_v3  ;;  %s926_s22 = smov (!%p303_p13, %s739_s22), 1 }
  0x32   : > { %v315_v6 = vadd.s32 8, %v314_v2  ;;  %v334_v14 = vsub.f32 %v332_v10, %v324_v4  ;;  %v329_v15 = vand.u32 2147483647, %v327_v8  ;;  %s305_s16 = scalar_lea.vmem %s907_s4, %s926_s22 }
  0x33   : > { %v330_v16 = vand.u32 2147483647, %v328_v12  ;;  %v335_v17 = vand.u32 2147483647, %v333_v13 }
  0x34   : > { %v320_v11 = vstv %s319_s25  ;;  %v336_v18 = vand.u32 2147483647, %v334_v14 }
  0x35   : > { %vm321_vm1 = vcmp.lt.s32.totalorder %v314_v2, %v320_v11  ;;  %vm322_vm2 = vcmp.lt.s32.totalorder %v315_v6, %v320_v11  ;;  %v337_v19 = vadd.f32 %v335_v17, %v329_v15 }
  0x36   : > { %v338_v20 = vadd.f32 %v336_v18, %v330_v16  ;;  %v345_v31 = vld [vmem:[#allocation2] sm:$0x1] }
  0x37   : > { %v343_v21 = vsel %vm321_vm1, %v337_v19, 0.0 }
  0x38   : > { %v344_v22 = vsel %vm322_vm2, %v338_v20, 0.0  ;;  %v347_v23 = vsel %vm346_vm3, %v343_v21, 0.0 }
  0x39   : > { %v348_v24 = vsel %vm346_vm3, %v344_v22, 0.0 }
  0x3a   : > { %v349_v25 = vadd.f32 %v348_v24, %v347_v23 }
  0x3c   : > { %v350_v26 = vrot.slane %v349_v25, 4 }
  0x3e   : > { %v351_v27 = vadd.f32 %v350_v26, %v349_v25 }
  0x40   : > { %v352_v28 = vrot.slane %v351_v27, 2 }
  0x42   : > { %v353_v29 = vadd.f32 %v352_v28, %v351_v27 }
  0x44   : > { %v354_v30 = vrot.slane %v353_v29, 1 }
  0x46   : > { %v355_v32 = vadd.f32 %v354_v30, %v353_v29 }
  0x48   : > { %v356_v33 = vadd.f32 %v355_v32, %v345_v31 }
  0x4a   : > { %358 = vst.msk [vmem:[#allocation2] sm:$0x1] %vm310_vm0, %v356_v33 }
  0x51   : > { %v362_v34 = vld [vmem:[#allocation2] sm:$0x1] }
  0x52   : > { %v363_v35 = vsel %vm310_vm0, %v362_v34, 0.0 }
  0x53   : > { %364 = vadd.xlane.f32.xlu0 %v363_v35 }
  0xc6   : > { %v365_v36 = vpop.xlane.xlu0 %364 }
  0xc7   : > { %v366_v37 = vrot.slane %v365_v36, 4 }
  0xc9   : > { %v367_v38 = vadd.f32 %v366_v37, %v365_v36 }
  0xcb   : > { %v368_v39 = vrot.slane %v367_v38, 2 }
  0xcd   : > { %v369_v40 = vadd.f32 %v368_v39, %v367_v38 }
  0xcf   : > { %v370_v41 = vrot.slane %v369_v40, 1 }
  0xd1   : > { %v371_v42 = vadd.f32 %v370_v41, %v369_v40 }
  0xd3   : > { %518 = vpush %v371_v42 }
 0x104   : > { %s519_s17 = spop %518 }
 0x105   : > { %v373_v43 = vstv %s519_s17 }
 0x106   : > { %376 = vst.msk [vmem:[%s305_s16] sm:$0x1] %vm375_vm4, %v373_v43 }
 0x107 PF: > { %s28_s0 = sadd.s32 1, %s747_s0   ;;  %s917_s18 = sld [smem:[#allocation13_spill]] }
 0x108   : > { %p25_p0 = scmp.ge.s32.totalorder %s28_s0, 4   ;;  %s918_s19 = smov %s731_s20 }
 0x109   : > { %s919_s20 = smov %s735_s21  ;;  %s920_s21 = smov %s828_s29 }
 0x10a   : > { %s921_s22 = smov %s743_s23  ;;  %27 = sbr.rel (!%p25_p0) target bundleno = 12 (0xc), region = 104 }
 0x10d   : > { %s922_s23 = smov %s917_s18 }
 0x10f   :  { %394 = vsyncpa [#allocation6], 1 }
 0x110   :  { %396 = vsyncpa [#allocation6 + $0x1], 1 }
 0x111   :  { %397 = vsyncpa [#allocation8], 1 }
 0x112   :  { %399 = vsyncpa [#allocation8 + $0x1], 1 }

</bundles_post_ra>
